<compile_context>
chip_gen: v5e
topology: v5e:2x2
jax: 0.10.0
libtpu: 0.0.40
codegen_flags: <defaults>
</compile_context>

<pallas_src>
import functools

import jax
import jax.numpy as jnp
from jax.experimental import pallas as pl
from jax.experimental.pallas import tpu as pltpu


def _round_up(n: int, m: int) -> int:
    return (n + m - 1) // m * m


def _vmem_capacity_bytes() -> int:
    """Physical per-core VMEM; conservative 64 MiB (v7x) fallback."""
    try:
        return int(pltpu.get_tpu_info().vmem_capacity_bytes)
    except Exception:
        return 64 * 2**20


def _mlp_kernel(x_ref, w1_ref, b1_ref, w2_ref, b2_ref, o_ref, acc_ref, *, act):
    """One (TM, H) token tile x one (TI) slice of the intermediate dim.

    fc1 partial -> activation (f32) -> fc2 partial accumulated into f32 scratch.
    """
    k = pl.program_id(1)

    @pl.when(k == 0)
    def _init():
        acc_ref[...] = jnp.zeros_like(acc_ref)

    # fc1 partial: (TM, H) @ (H, TI) with f32 MXU accumulation.
    h = jnp.dot(x_ref[...], w1_ref[...], preferred_element_type=jnp.float32)
    h = h + b1_ref[...]                       # bias kept in f32 (no bf16 round-trip)
    if act == "silu":
        h = h * jax.nn.sigmoid(h)             # SiLU in f32 (sigmoid on EUP)
    else:
        h = jax.nn.gelu(h, approximate=False)  # matches torch.nn.functional.gelu
    # fc2 partial: (TM, TI) @ (TI, H) accumulated into the f32 scratch.
    acc_ref[...] += jnp.dot(h.astype(w2_ref.dtype), w2_ref[...],
                            preferred_element_type=jnp.float32)

    @pl.when(k == pl.num_programs(1) - 1)
    def _finalize():
        o_ref[...] = (acc_ref[...] + b2_ref[...]).astype(o_ref.dtype)


def prepare_mlp_params(w1, b1, w2, b2, *, param_dtype=None):
    """Transpose / zero-pad / cast the weights ONCE at load time.

    w1: fc1.weight (I, H), b1: fc1.bias (I,), w2: fc2.weight (H, I), b2: (H,).
    Returns (w1_t (H_pad, I_pad), b1 (1, I_pad) f32, w2_t (I_pad, H_pad),
    b2 (1, H_pad) f32).  param_dtype=jnp.bfloat16 is the recommended
    production setting (especially on v5e); accumulation stays f32.
    """
    I, H = w1.shape
    assert w2.shape == (H, I), "fc2.weight must be (hidden, intermediate)"
    H_pad = _round_up(H, 128)
    I_pad = _round_up(I, 128)
    pdt = jnp.dtype(w1.dtype if param_dtype is None else param_dtype)
    w1p = jnp.pad(w1.T.astype(pdt), ((0, H_pad - H), (0, I_pad - I)))   # (H_pad, I_pad)
    w2p = jnp.pad(w2.T.astype(pdt), ((0, I_pad - I), (0, H_pad - H)))   # (I_pad, H_pad)
    # Biases stay f32: negligible VMEM/DMA, avoids avoidable rounding.
    b1p = jnp.pad(b1.astype(jnp.float32), (0, I_pad - I)).reshape(1, I_pad)
    b2p = jnp.pad(b2.astype(jnp.float32), (0, H_pad - H)).reshape(1, H_pad)
    return w1p, b1p, w2p, b2p


@functools.partial(jax.jit, static_argnames=("block_m", "out_dtype", "act"))
def mlp_forward(x, w1p, b1p, w2p, b2p, *, block_m=None, out_dtype=None, act="silu"):
    """x: (B, S, H). Params from prepare_mlp_params (pre-padded / pre-cast)."""
    B, S, H = x.shape
    M = B * S
    H_pad, I_pad = w1p.shape
    cdt = w1p.dtype                       # storage/compute dtype fed to the MXU
    bp = cdt.itemsize
    odt = jnp.dtype(x.dtype if out_dtype is None else out_dtype)
    ob = odt.itemsize

    # ---- token tile (sublane alignment: 16 rows for bf16, 32 for 1B, 8 f32)
    sub_align = {1: 32, 2: 16}.get(bp, 8)
    if block_m is None:
        block_m = 512 if bp <= 2 else 256
    TM = min(block_m, _round_up(M, sub_align))
    if pl.cdiv(M, TM) < 2 and M > sub_align:
        # Small-M (decode) case: make sure the "parallel" token axis has >= 2
        # steps so both TensorCores of a v7x megacore get a tile.
        TM = _round_up(pl.cdiv(M, 2), sub_align)
    num_m = pl.cdiv(M, TM)

    # ---- intermediate-dim (K) tile from the per-generation VMEM budget ----
    cap = _vmem_capacity_bytes()
    budget = int(cap * 0.80)                                  # headroom for Mosaic scratch
    fixed = (TM * H_pad * (2 * bp + 2 * ob + 4)               # x / out double-buffers + f32 acc
             + 2 * H_pad * 4)                                 # b2 (f32, single buffer)
    per_ti = 4 * H_pad * bp + 6 * TM + 8                      # w1+w2 K-slices (x2 buf), f32 h, b1
    ti_target = max(128, (budget - fixed) // max(per_ti, 1))
    # Largest multiple of 128 that divides I_pad and fits the budget.
    q = I_pad // 128
    TI = 128
    for d in range(min(q, max(1, ti_target // 128)), 0, -1):
        if q % d == 0:
            TI = d * 128
            break
    num_k = I_pad // TI

    vmem_est = fixed + TI * per_ti
    vmem_limit = int(min(0.9 * cap, max(32 * 2**20, 1.5 * vmem_est)))

    # ---- activations: cast (and lane-pad only if H is not 128-aligned) ----
    x2d = x.reshape(M, H).astype(cdt)
    if H_pad != H:
        x2d = jnp.pad(x2d, ((0, 0), (0, H_pad - H)))
    # No token-dim padding: cdiv grid + Pallas masking of the ragged tail.

    cost = pl.CostEstimate(
        flops=4 * M * H_pad * I_pad,                           # two matmuls
        transcendentals=M * I_pad,                             # sigmoid / erf
        bytes_accessed=int(M * H_pad * bp + M * H_pad * ob     # x read + out write
                           + num_m * 2 * H_pad * I_pad * bp    # weights per token tile
                           + 4 * (I_pad + H_pad)),             # f32 biases
    )

    out = pl.pallas_call(
        functools.partial(_mlp_kernel, act=act),
        out_shape=jax.ShapeDtypeStruct((M, H_pad), odt),
        grid=(num_m, num_k),
        in_specs=[
            # activation tile: changes only with the token index (prefetched)
            pl.BlockSpec((TM, H_pad), lambda i, k: (i, 0)),
            # fc1 / fc2 weight K-slices: pipelined over the inner K axis
            pl.BlockSpec((H_pad, TI), lambda i, k: (0, k)),
            pl.BlockSpec((1, TI), lambda i, k: (0, k)),        # b1 slice (f32)
            pl.BlockSpec((TI, H_pad), lambda i, k: (k, 0)),
            # b2 is the only constant-index input left -> single buffer
            pl.BlockSpec((1, H_pad), lambda i, k: (0, 0),
                         pipeline_mode=pl.Buffered(1)),
        ],
        out_specs=pl.BlockSpec((TM, H_pad), lambda i, k: (i, 0)),
        scratch_shapes=[pltpu.VMEM((TM, H_pad), jnp.float32)],
        compiler_params=pltpu.CompilerParams(
            dimension_semantics=("parallel", "arbitrary"),
            vmem_limit_bytes=vmem_limit,
        ),
        cost_estimate=cost,
    )(x2d, w1p, b1p, w2p, b2p)

    if H_pad != H:
        out = out[:, :H]
    return out.reshape(B, S, H)


def reference_mlp(x, w1, b1, w2, b2):
    h = x @ w1.T + b1
    h = h * jax.nn.sigmoid(h)
    return h @ w2.T + b2


if __name__ == "__main__":
    # Config (synthetic, matches the module's shape conventions):
    #   hidden_size=32, intermediate_size=64, hidden_act='silu'
    batch, seq, hidden, intermediate = 2, 8, 32, 64

    key = jax.random.PRNGKey(0)
    kx, k1, kb1, k2, kb2 = jax.random.split(key, 5)

    x = jax.random.normal(kx, (batch, seq, hidden), dtype=jnp.float32)
    # PyTorch nn.Linear conventions: fc1.weight (I, H), fc2.weight (H, I).
    w1 = jax.random.normal(k1, (intermediate, hidden), dtype=jnp.float32) * 0.05
    b1 = jax.random.normal(kb1, (intermediate,), dtype=jnp.float32) * 0.05
    w2 = jax.random.normal(k2, (hidden, intermediate), dtype=jnp.float32) * 0.05
    b2 = jax.random.normal(kb2, (hidden,), dtype=jnp.float32) * 0.05

    ref = reference_mlp(x, w1, b1, w2, b2)

    # f32 path: strict check vs reference.
    params_f32 = prepare_mlp_params(w1, b1, w2, b2)
    out_f32 = jax.block_until_ready(mlp_forward(x, *params_f32))
    assert out_f32.shape == (batch, seq, hidden)
    assert jnp.allclose(out_f32, ref, atol=1e-5, rtol=1e-5), "f32 mismatch vs reference"

    # bf16-storage / f32-accumulate path (recommended production setting,
    # especially on v5e); bf16 output halves writeback traffic.
    params_bf16 = prepare_mlp_params(w1, b1, w2, b2, param_dtype=jnp.bfloat16)
    out_bf16 = jax.block_until_ready(
        mlp_forward(x, *params_bf16, out_dtype=jnp.bfloat16))
    assert out_bf16.shape == (batch, seq, hidden)
    assert out_bf16.dtype == jnp.bfloat16
    assert jnp.allclose(out_bf16.astype(jnp.float32), ref, atol=3e-2, rtol=3e-2), \
        "bf16 mismatch vs reference"

    print("KERNEL_OK")
</pallas_src>

<mosaic_0001>
module attributes {stable_mosaic.version = 11 : i64} {
  func.func @_mlp_kernel(%arg0: i32, %arg1: i32, %arg2: memref<8x128xf32, #tpu.memory_space<vmem>>, %arg3: memref<128x128xf32, #tpu.memory_space<vmem>>, %arg4: memref<1x128xf32, #tpu.memory_space<vmem>>, %arg5: memref<128x128xf32, #tpu.memory_space<vmem>>, %arg6: memref<1x128xf32, #tpu.memory_space<vmem>>, %arg7: memref<8x128xf32, #tpu.memory_space<vmem>>, %arg8: memref<8x128xf32, #tpu.memory_space<vmem>>) attributes {dimension_semantics = [#tpu.dimension_semantics<parallel>, #tpu.dimension_semantics<arbitrary>], iteration_bounds = array<i64: 2, 1>, scalar_prefetch = 0 : i64, scratch_operands = 1 : i64, tpu.core_type = #tpu.core_type<tc>, window_params = [{transform_indices = @transform_0, window_bounds = array<i64: 8, 128>}, {transform_indices = @transform_1, window_bounds = array<i64: 128, 128>}, {transform_indices = @transform_2, window_bounds = array<i64: 1, 128>}, {transform_indices = @transform_3, window_bounds = array<i64: 128, 128>}, {pipeline_mode = #tpu.pipeline_mode<synchronous>, transform_indices = @transform_4, window_bounds = array<i64: 1, 128>}, {transform_indices = @transform_5, window_bounds = array<i64: 8, 128>}]} {
    %c0_i32 = arith.constant 0 : i32
    %0 = arith.cmpi eq, %arg1, %c0_i32 : i32
    %1 = arith.extui %0 : i1 to i32
    %c0_i32_0 = arith.constant 0 : i32
    %2 = arith.cmpi ne, %1, %c0_i32_0 : i32
    scf.if %2 {
      %cst_16 = arith.constant 0.000000e+00 : f32
      %23 = vector.broadcast %cst_16 : f32 to vector<8x128xf32>
      %c0_17 = arith.constant 0 : index
      %c0_18 = arith.constant 0 : index
      %24 = vector.load %arg8[%c0_17, %c0_18] : memref<8x128xf32, #tpu.memory_space<vmem>>, vector<8x128xf32>
      tpu.vector_store %arg8[%c0_17, %c0_18], %23 {strides = array<i32>} : memref<8x128xf32, #tpu.memory_space<vmem>>, vector<8x128xf32>,
    } else {
    }
    %c0 = arith.constant 0 : index
    %c0_1 = arith.constant 0 : index
    %3 = vector.load %arg2[%c0, %c0_1] : memref<8x128xf32, #tpu.memory_space<vmem>>, vector<8x128xf32>
    %c0_2 = arith.constant 0 : index
    %c0_3 = arith.constant 0 : index
    %4 = vector.load %arg3[%c0_2, %c0_3] : memref<128x128xf32, #tpu.memory_space<vmem>>, vector<128x128xf32>
    %cst = arith.constant dense<0.000000e+00> : vector<8x128xf32>
    %5 = tpu.matmul %3, %4, %cst {dimension_numbers = #tpu.dot_dimension_numbers<[1], [0], [0], [1], [0, 0, 1, 1], [], []>} : vector<8x128xf32>, vector<128x128xf32>, vector<8x128xf32> -> vector<8x128xf32>
    %c0_4 = arith.constant 0 : index
    %c0_5 = arith.constant 0 : index
    %6 = vector.load %arg4[%c0_4, %c0_5] : memref<1x128xf32, #tpu.memory_space<vmem>>, vector<1x128xf32>
    %7 = vector.broadcast %6 : vector<1x128xf32> to vector<8x128xf32>
    %8 = arith.addf %5, %7 : vector<8x128xf32>
    %9 = arith.negf %8 : vector<8x128xf32>
    %10 = math.exp %9 : vector<8x128xf32>
    %cst_6 = arith.constant 1.000000e+00 : f32
    %11 = vector.broadcast %cst_6 : f32 to vector<8x128xf32>
    %12 = arith.addf %11, %10 : vector<8x128xf32>
    %13 = arith.divf %11, %12 : vector<8x128xf32>
    %14 = arith.mulf %8, %13 : vector<8x128xf32>
    %c0_7 = arith.constant 0 : index
    %c0_8 = arith.constant 0 : index
    %15 = vector.load %arg8[%c0_7, %c0_8] : memref<8x128xf32, #tpu.memory_space<vmem>>, vector<8x128xf32>
    %c0_9 = arith.constant 0 : index
    %c0_10 = arith.constant 0 : index
    %16 = vector.load %arg5[%c0_9, %c0_10] : memref<128x128xf32, #tpu.memory_space<vmem>>, vector<128x128xf32>
    %cst_11 = arith.constant dense<0.000000e+00> : vector<8x128xf32>
    %17 = tpu.matmul %14, %16, %cst_11 {dimension_numbers = #tpu.dot_dimension_numbers<[1], [0], [0], [1], [0, 0, 1, 1], [], []>} : vector<8x128xf32>, vector<128x128xf32>, vector<8x128xf32> -> vector<8x128xf32>
    %18 = arith.addf %15, %17 : vector<8x128xf32>
    %c0_12 = arith.constant 0 : index
    %c0_13 = arith.constant 0 : index
    %19 = vector.load %arg8[%c0_12, %c0_13] : memref<8x128xf32, #tpu.memory_space<vmem>>, vector<8x128xf32>
    tpu.vector_store %arg8[%c0_12, %c0_13], %18 {strides = array<i32>} : memref<8x128xf32, #tpu.memory_space<vmem>>, vector<8x128xf32>,
    %c0_i32_14 = arith.constant 0 : i32
    %20 = arith.cmpi eq, %arg1, %c0_i32_14 : i32
    %21 = arith.extui %20 : i1 to i32
    %c0_i32_15 = arith.constant 0 : i32
    %22 = arith.cmpi ne, %21, %c0_i32_15 : i32
    scf.if %22 {
      %c0_16 = arith.constant 0 : index
      %c0_17 = arith.constant 0 : index
      %23 = vector.load %arg8[%c0_16, %c0_17] : memref<8x128xf32, #tpu.memory_space<vmem>>, vector<8x128xf32>
      %c0_18 = arith.constant 0 : index
      %c0_19 = arith.constant 0 : index
      %24 = vector.load %arg6[%c0_18, %c0_19] : memref<1x128xf32, #tpu.memory_space<vmem>>, vector<1x128xf32>
      %25 = vector.broadcast %24 : vector<1x128xf32> to vector<8x128xf32>
      %26 = arith.addf %23, %25 : vector<8x128xf32>
      %c0_20 = arith.constant 0 : index
      %c0_21 = arith.constant 0 : index
      %27 = vector.load %arg7[%c0_20, %c0_21] : memref<8x128xf32, #tpu.memory_space<vmem>>, vector<8x128xf32>
      tpu.vector_store %arg7[%c0_20, %c0_21], %26 {strides = array<i32>} : memref<8x128xf32, #tpu.memory_space<vmem>>, vector<8x128xf32>,
    } else {
    }
    return
  }
  func.func @transform_0(%arg0: i32, %arg1: i32) -> (i32, i32) {
    %c0_i32 = arith.constant 0 : i32
    %c0_i32_0 = arith.constant 0 : i32
    return %arg0, %c0_i32 : i32, i32
  }
  func.func @transform_1(%arg0: i32, %arg1: i32) -> (i32, i32) {
    %c0_i32 = arith.constant 0 : i32
    %c0_i32_0 = arith.constant 0 : i32
    return %c0_i32, %arg1 : i32, i32
  }
  func.func @transform_2(%arg0: i32, %arg1: i32) -> (i32, i32) {
    %c0_i32 = arith.constant 0 : i32
    %c0_i32_0 = arith.constant 0 : i32
    return %c0_i32, %arg1 : i32, i32
  }
  func.func @transform_3(%arg0: i32, %arg1: i32) -> (i32, i32) {
    %c0_i32 = arith.constant 0 : i32
    %c0_i32_0 = arith.constant 0 : i32
    return %arg1, %c0_i32 : i32, i32
  }
  func.func @transform_4(%arg0: i32, %arg1: i32) -> (i32, i32) {
    %c0_i32 = arith.constant 0 : i32
    %c0_i32_0 = arith.constant 0 : i32
    %c0_i32_1 = arith.constant 0 : i32
    return %c0_i32, %c0_i32_0 : i32, i32
  }
  func.func @transform_5(%arg0: i32, %arg1: i32) -> (i32, i32) {
    %c0_i32 = arith.constant 0 : i32
    %c0_i32_0 = arith.constant 0 : i32
    return %arg0, %c0_i32 : i32, i32
  }
}

</mosaic_0001>

<bundles_post_ra>
// kernel: mlp_forward.1
= control target key start
LH: loop header
LB: loop body
LE: loop exit
PB: predicated region body
PF: predicated region fallthrough
CT: control target
= control target key end

     0   :  { %10 = vsyncpa [#allocation4], 0  ;;  %s784_s0 = inlined_call_operand.vmem [shape: f32[16,128], index: 0, kind: input, shape index: {}]   ;;  %s785_s1 = inlined_call_operand.hbm [shape: f32[128,128], index: 1, kind: input, shape index: {}]   ;;  %s786_s2 = inlined_call_operand.vmem [shape: f32[1,128], index: 2, kind: input, shape index: {}]   ;;  %s787_s3 = inlined_call_operand.hbm [shape: f32[128,128], index: 3, kind: input, shape index: {}]   ;;  %s788_s4 = inlined_call_operand.vmem [shape: f32[1,128], index: 4, kind: input, shape index: {}]   ;;  %s789_s5 = inlined_call_operand.vmem [shape: f32[16,128], index: 5, kind: output, shape index: {}]  }
   0x1   :  { %11 = vsyncpa [#allocation6], 0  ;;  %s705_s18 = smov 0   ;;  %s707_s19 = smov 0  }
   0x2   :  { %s709_s20 = smov 0  }
   0x3 LB: > { %s511_s21 = sadd.s32 4294967295, %s669_s20   ;;  %s29_s22 = sadd.s32 1, %s665_s19  ;;  %s669_s20 = sphi %s709_s20, %s17_s20   ;;  %s665_s19 = sphi %s707_s19, %s793_s19   ;;  %s661_s18 = sphi %s705_s18, %s792_s18  }
   0x4   : > { %p31_p0 = scmp.ge.s32.totalorder %s29_s22, 2  ;;  %p513_p1 = scmp.ge.s32.totalorder %s669_s20, 1 }
   0x5   : > { %p185_p2 = scmp.lt.s32.totalorder %s669_s20, 3  ;;  %p730_p4 = scmp.eq.s32.totalorder %s511_s21, 0 }
   0x6   : > { %s795_s22 = smov (%p31_p0, %s29_s22), 0  ;;  %s198_s27 = sshll.u32 %s785_s1, 4  ;;  %s199_s27 = int_to_ptr.hbm [resolvable:$true] %s198_s27 }
   0x7   : > { %p726_p3 = pnand %p513_p1, %p185_p2  ;;  %s671_s28 = smov [#allocation3]  }
   0x8   : > { %s200_s29 = sshll.u32 %s671_s28, 4  ;;  %s221_s7 = sshll.u32 %s787_s3, 4  ;;  %s201_s29 = int_to_ptr.vmem [resolvable:$true] %s200_s29  ;;  %s222_s7 = int_to_ptr.hbm [resolvable:$true] %s221_s7 }
   0x9   : > { %p534_p5 = pneg %p726_p3  ;;  %s672_s8 = smov 128  }
   0xa   : > { %s673_s9 = smov 8   ;;  %s674_s10 = smov [#allocation5]  }
   0xb   : > { %p535_p6 = pnand %p730_p4, %p534_p5  ;;  %s223_s11 = sshll.u32 %s674_s10, 4  ;;  %s224_s11 = int_to_ptr.vmem [resolvable:$true] %s223_s11 }
   0xc   : > { %249 = sbr.rel (%p726_p3) target bundleno = 339 (0x153), region = 40 }
   0xd   : > { %537 = dma.hbm_to_vmem [thread:$0]  (!%p535_p6), %s199_s27, 2048, %s201_s29, [#allocation4], %s672_s8, %s672_s8, %s673_s9  }
   0xe   : > { %540 = dma.hbm_to_vmem [thread:$0]  (!%p535_p6), %s222_s7, 2048, %s224_s11, [#allocation6], %s672_s8, %s672_s8, %s673_s9  }
  0x11   : > { %652 = dma.done.wait (%p730_p4), [#allocation4], 2048  }
  0x12   : > { %654 = vsyncadd (%p730_p4), [#allocation4], 4294965248 }
  0x13   : > { %656 = dma.done.wait (%p730_p4), [#allocation6], 2048  }
  0x14   : > { %658 = vsyncadd (%p730_p4), [#allocation6], 4294965248  ;;  %v317_v0 = vld [vmem:[#allocation3 + $0x78] sm:$0xff]  ;;  %v316_v1 = vld [vmem:[#allocation3 + $0x70] sm:$0xff]  ;;  %p284_p7 = scmp.lt.s32.totalorder %s661_s18, 1 }
  0x15   : > { %322 = vmatpush.msra.mxu0 %v317_v0  ;;  %v315_v2 = vld [vmem:[#allocation3 + $0x68] sm:$0xff]  ;;  %v314_v3 = vld [vmem:[#allocation3 + $0x60] sm:$0xff]  ;;  %v313_v4 = vld [vmem:[#allocation3 + $0x58] sm:$0xff] }
  0x16   : > { %v312_v5 = vld [vmem:[#allocation3 + $0x50] sm:$0xff]  ;;  %v311_v6 = vld [vmem:[#allocation3 + $0x48] sm:$0xff]  ;;  %v310_v7 = vld [vmem:[#allocation3 + $0x40] sm:$0xff]  ;;  %s797_s18 = smov (!%p284_p7, %s661_s18), 1 }
  0x17   : > { %323 = vmatpush.msra.mxu0 %v316_v1  ;;  %v309_v8 = vld [vmem:[#allocation3 + $0x38] sm:$0xff]  ;;  %v308_v9 = vld [vmem:[#allocation3 + $0x30] sm:$0xff]  ;;  %v307_v10 = vld [vmem:[#allocation3 + $0x28] sm:$0xff]  ;;  %s521_s12 = sshll.u32 %s797_s18, 3 }
  0x18   : > { %v306_v11 = vld [vmem:[#allocation3 + $0x20] sm:$0xff]  ;;  %v305_v12 = vld [vmem:[#allocation3 + $0x18] sm:$0xff]  ;;  %v304_v13 = vld [vmem:[#allocation3 + $0x10] sm:$0xff]  ;;  %s287_s15 = scalar_lea.vmem %s784_s0, %s521_s12  ;;  %s295_s26 = scalar_lea.vmem %s789_s5, %s521_s12 }
  0x19   : > { %324 = vmatpush.msra.mxu0 %v315_v2  ;;  %v303_v14 = vld [vmem:[#allocation3 + $0x8] sm:$0xff]  ;;  %v302_v15 = vld [vmem:[#allocation3] sm:$0xff]  ;;  %v378_v17 = vld [vmem:[#allocation5 + $0x78] sm:$0xff] }
  0x1a   : > { %v301_v16 = vld [vmem:[%s287_s15] sm:$0xff]  ;;  %379 = vmatpush.msra.mxu1 %v378_v17  ;;  %v377_v18 = vld [vmem:[#allocation5 + $0x70] sm:$0xff]  ;;  %v376_v19 = vld [vmem:[#allocation5 + $0x68] sm:$0xff] }
  0x1b   : > { %325 = vmatpush.msra.mxu0 %v314_v3  ;;  %v375_v20 = vld [vmem:[#allocation5 + $0x60] sm:$0xff]  ;;  %v374_v21 = vld [vmem:[#allocation5 + $0x58] sm:$0xff]  ;;  %v373_v22 = vld [vmem:[#allocation5 + $0x50] sm:$0xff] }
  0x1c   : > { %380 = vmatpush.msra.mxu1 %v377_v18  ;;  %v372_v23 = vld [vmem:[#allocation5 + $0x48] sm:$0xff]  ;;  %v371_v24 = vld [vmem:[#allocation5 + $0x40] sm:$0xff]  ;;  %v370_v25 = vld [vmem:[#allocation5 + $0x38] sm:$0xff] }
  0x1d   : > { %326 = vmatpush.msra.mxu0 %v313_v4  ;;  %v369_v26 = vld [vmem:[#allocation5 + $0x30] sm:$0xff]  ;;  %v368_v27 = vld [vmem:[#allocation5 + $0x28] sm:$0xff]  ;;  %v367_v28 = vld [vmem:[#allocation5 + $0x20] sm:$0xff] }
  0x1e   : > { %381 = vmatpush.msra.mxu1 %v376_v19  ;;  %v366_v29 = vld [vmem:[#allocation5 + $0x18] sm:$0xff]  ;;  %v365_v30 = vld [vmem:[#allocation5 + $0x10] sm:$0xff]  ;;  %v364_v31 = vld [vmem:[#allocation5 + $0x8] sm:$0xff] }
  0x1f   : > { %327 = vmatpush.msra.mxu0 %v312_v5  ;;  %v573_v32 = vld [vmem:[%s786_s2] ss:$0 sm:$0xff] }
  0x20   : > { %382 = vmatpush.msra.mxu1 %v375_v20  ;;  %v363_v33 = vld [vmem:[#allocation5] sm:$0xff] }
  0x21   : > { %328 = vmatpush.msra.mxu0 %v311_v6  ;;  %v574_v50 = vld [vmem:[%s788_s4] ss:$0 sm:$0xff] }
  0x22   : > { %383 = vmatpush.msra.mxu1 %v374_v21 }
  0x23   : > { %329 = vmatpush.msra.mxu0 %v310_v7 }
  0x24   : > { %384 = vmatpush.msra.mxu1 %v373_v22 }
  0x25   : > { %330 = vmatpush.msra.mxu0 %v309_v8 }
  0x26   : > { %385 = vmatpush.msra.mxu1 %v372_v23 }
  0x27   : > { %331 = vmatpush.msra.mxu0 %v308_v9 }
  0x28   : > { %386 = vmatpush.msra.mxu1 %v371_v24 }
  0x29   : > { %332 = vmatpush.msra.mxu0 %v307_v10 }
  0x2a   : > { %387 = vmatpush.msra.mxu1 %v370_v25 }
  0x2b   : > { %333 = vmatpush.msra.mxu0 %v306_v11 }
  0x2c   : > { %388 = vmatpush.msra.mxu1 %v369_v26 }
  0x2d   : > { %334 = vmatpush.msra.mxu0 %v305_v12 }
  0x2e   : > { %389 = vmatpush.msra.mxu1 %v368_v27 }
  0x2f   : > { %335 = vmatpush.msra.mxu0 %v304_v13 }
  0x30   : > { %390 = vmatpush.msra.mxu1 %v367_v28 }
  0x31   : > { %336 = vmatpush.msra.mxu0 %v303_v14 }
  0x32   : > { %391 = vmatpush.msra.mxu1 %v366_v29 }
  0x33   : > { %337 = vmatpush.msra.mxu0 %v302_v15 }
  0x34   : > { %338 = vmatmul.f32.vlgmr.msra.gmra.mxu0 %v301_v16  ;;  %392 = vmatpush.msra.mxu1 %v365_v30 }
  0x36   : > { %393 = vmatpush.msra.mxu1 %v364_v31 }
  0x38   : > { %394 = vmatpush.msra.mxu1 %v363_v33 }
  0xb1   : > { %v339_v34 = vpop.f32.mrf.mxu0 }
  0xb2   : > { %v340_v35 = vadd.f32 %v573_v32, %v339_v34 }
  0xb4   : > { %v523_v36 = vmul.f32 -1.442695, %v340_v35 }
  0xb6   : > { %575 = vpow2.f32 %v523_v36 }
  0xbc   : > { %v576_v37 = vpop.eup %575 }
  0xbd   : > { %v345_v38 = vadd.f32 1.0, %v576_v37 }
  0xbf   : > { %577 = vrcp.f32 %v345_v38  ;;  %v357_v42 = vand.u32 2147483648, %v345_v38  ;;  %v355_v44 = vand.u32 2147483647, %v345_v38  ;;  %vm351_vm1 = vweird.f32 %v345_v38 }
  0xc1   : > { %v358_v46 = vor.u32 1.1754944e-38, %v357_v42  ;;  %vm356_vm3 = vcmp.eq.f32.partialorder %v355_v44, 8.507059e+37 }
  0xc5   : > { %v578_v39 = vpop.eup %577 }
  0xc6   : > { %v347_v40 = vmul.f32 %v578_v39, %v345_v38  ;;  %vm352_vm0 = vweird.f32 %v578_v39 }
  0xc7   : > { %vm353_vm2 = vmor %vm351_vm1, %vm352_vm0 }
  0xc8   : > { %v348_v41 = vsub.f32 1.0, %v347_v40 }
  0xca   : > { %v349_v43 = vmul.f32 %v578_v39, %v348_v41 }
  0xcc   : > { %v350_v45 = vadd.f32 %v578_v39, %v349_v43 }
  0xce   : > { %v354_v47 = vsel %vm353_vm2, %v578_v39, %v350_v45 }
  0xcf   : > { %v359_v48 = vsel %vm356_vm3, %v358_v46, %v354_v47 }
  0xd0   : > { %v361_v49 = vmul.f32 %v359_v48, %v340_v35 }
  0xd2   : > { %395 = vmatmul.f32.vlgmr.msra.gmra.mxu1 %v361_v49 }
 0x14f   : > { %v396_v51 = vpop.f32.mrf.mxu1 }
 0x150   : > { %v409_v52 = vadd.f32 %v574_v50, %v396_v51 }
 0x152   : > { %410 = vst [vmem:[%s295_s26] sm:$0xff] %v409_v52 }
 0x153 PF: > { %s17_s20 = sadd.s32 1, %s669_s20   ;;  %s792_s18 = smov %s665_s19 }
 0x154   : > { %p14_p8 = scmp.ge.s32.totalorder %s17_s20, 4   ;;  %s793_s19 = smov %s795_s22 }
 0x156   :  { %16 = sbr.rel (!%p14_p8) target bundleno = 3 (0x3), region = 92 }
 0x15b   :  { %430 = vsyncpa [#allocation4], 1 }
 0x15c   :  { %432 = vsyncpa [#allocation4 + $0x1], 1 }
 0x15d   :  { %433 = vsyncpa [#allocation6], 1 }

</bundles_post_ra>
